<compile_context>
chip_gen: v6e
topology: v6e:2x2x1
jax: 0.10.0
libtpu: 0.0.40
codegen_flags: <defaults>
</compile_context>

<pallas_src>
import functools
import math

import jax
import jax.numpy as jnp
from jax.experimental import pallas as pl
from jax.experimental.pallas import tpu as pltpu


def _round_up(x: int, m: int) -> int:
    return (x + m - 1) // m * m


_GELU_C = math.sqrt(2.0 / math.pi)


def _gelu_tanh(x):
    # nn.GELU(approximate='tanh')
    return 0.5 * x * (1.0 + jnp.tanh(_GELU_C * (x + 0.044715 * x * x * x)))


# ----------------------------- kernel ---------------------------------------
def mlp_kernel(x_ref, w_fc_ref, b_fc_ref, w_proj_ref, b_proj_ref, o_ref,
               acc_ref, *, mm_dtype, gelu_dtype):
    h = pl.program_id(1)

    @pl.when(h == 0)
    def _():
        acc_ref[...] = jnp.zeros_like(acc_ref)

    # c_fc chunk: (tile_m, C) @ (C, tile_h) -> f32 accumulate on the MXU.
    x = x_ref[...].astype(mm_dtype)
    fc = jnp.dot(x, w_fc_ref[...].astype(mm_dtype),
                 preferred_element_type=jnp.float32)
    # Bias + tanh-GELU (bf16 on v6e/v7x, f32 on v5e and older).
    fc = (fc + b_fc_ref[...]).astype(gelu_dtype)
    g = _gelu_tanh(fc)

    # Partial c_proj: (tile_m, tile_h) @ (tile_h, C), accumulated in f32.
    acc_ref[...] += jnp.dot(g.astype(mm_dtype), w_proj_ref[...].astype(mm_dtype),
                            preferred_element_type=jnp.float32)

    @pl.when(h == pl.num_programs(1) - 1)
    def _():
        o_ref[...] = (acc_ref[...] + b_proj_ref[...]).astype(o_ref.dtype)


# --------------------------- sizing helpers ----------------------------------
def _vmem_capacity_bytes() -> int:
    try:
        return int(pltpu.get_tpu_info().vmem_capacity_bytes)
    except Exception:
        return 64 * 1024 * 1024  # conservative: v7x per-TensorCore VMEM


def _has_bf16_vector_unit() -> bool:
    """True for v6e/v7x (bf16 VPU/EUP); False for v5e and older or unknown."""
    try:
        kind = jax.devices()[0].device_kind.lower()
    except Exception:
        return False
    if any(t in kind for t in ("v2", "v3", "v4", "v5")):
        return False
    return any(t in kind for t in ("v6", "v7", "tpu6", "tpu7"))


def _choose_tiles(M, C, H, x_bytes, out_bytes, vmem_budget):
    """Pick (tile_m, tile_h) so pipeline buffers + resident weights fit VMEM."""

    def vmem_bytes(tm, th):
        nh = -(-H // th)
        wbuf = 1 if nh == 1 else 2              # Buffered(1) when weights constant
        return (2 * tm * C * x_bytes            # x tile (double-buffered)
                + 2 * tm * C * out_bytes        # out tile (double-buffered)
                + tm * C * 4                    # f32 accumulator scratch
                + wbuf * 2 * C * th * 2         # w_fc + w_proj tiles (bf16)
                + wbuf * th * 4 + C * 4         # biases
                + 3 * tm * th * 4)              # fc / GELU f32 temporaries

    m8 = _round_up(M, 8)
    tm_cands = [t for t in (1024, 512, 256, 128) if t < m8]
    if m8 <= 1024:
        tm_cands.append(m8)
    if M >= 256:                                 # half-size tile => >=2 grid steps
        tm_cands.append(_round_up(-(-M // 2), 8))
    # minimize row padding, then prefer >=2 row tiles (megacore), then big tiles
    tm_cands = sorted(set(tm_cands),
                      key=lambda t: (_round_up(M, t) - M,
                                     1 if _round_up(M, t) // t < 2 else 0,
                                     -t))

    th_cands = [H] + [t for t in (2048, 1024, 512, 256, 128) if t < H]
    for th in th_cands:
        for tm in tm_cands:
            if vmem_bytes(tm, th) <= vmem_budget:
                return tm, th
    return min(tm_cands), (128 if H >= 128 else H)


# ------------------------------ wrapper ---------------------------------------
def mlp_forward(x, w_fc, b_fc, w_proj, b_proj, *, use_bf16: bool = True,
                out_dtype=None, tile_m: int | None = None,
                tile_h: int | None = None):
    """x: (B, T, C); w_fc: (C, 4C); b_fc: (4C,); w_proj: (4C, C); b_proj: (C,)."""
    B, T, C = x.shape
    H = w_fc.shape[1]
    M = B * T
    out_dtype = x.dtype if out_dtype is None else jnp.dtype(out_dtype)

    vmem_cap = _vmem_capacity_bytes()
    vmem_limit = int(0.70 * vmem_cap)
    vmem_budget = int(0.55 * vmem_cap)

    mm_dtype = jnp.bfloat16 if use_bf16 else jnp.float32
    gelu_dtype = (jnp.bfloat16
                  if (use_bf16 and _has_bf16_vector_unit()) else jnp.float32)

    # Activations kept in their incoming dtype (no extra HBM cast pass).
    x2 = x.reshape(M, C)
    x_bytes = x2.dtype.itemsize
    out_bytes = out_dtype.itemsize

    tm, th = _choose_tiles(M, C, H, x_bytes, out_bytes, vmem_budget)
    if tile_m is not None:
        tm = tile_m
    if tile_h is not None:
        th = tile_h

    m_pad = _round_up(M, tm)
    if m_pad != M:
        x2 = jnp.pad(x2, ((0, m_pad - M), (0, 0)))

    # Weights resident in the matmul dtype; biases stay f32.
    w_fc_c = w_fc.astype(mm_dtype)
    w_proj_c = w_proj.astype(mm_dtype)
    b_fc_c = b_fc.astype(jnp.float32).reshape(1, H)
    b_proj_c = b_proj.astype(jnp.float32).reshape(1, C)

    h_pad = _round_up(H, th)
    if h_pad != H:  # zero-pad hidden dim: GELU(0)=0 contributes nothing
        w_fc_c = jnp.pad(w_fc_c, ((0, 0), (0, h_pad - H)))
        w_proj_c = jnp.pad(w_proj_c, ((0, h_pad - H), (0, 0)))
        b_fc_c = jnp.pad(b_fc_c, ((0, 0), (0, h_pad - H)))

    grid = (m_pad // tm, h_pad // th)
    n_h = grid[1]

    kernel = functools.partial(mlp_kernel, mm_dtype=mm_dtype,
                               gelu_dtype=gelu_dtype)

    def make_call(single_buffer: bool):
        def spec(shape, index_map, resident):
            if single_buffer and resident:
                return pl.BlockSpec(shape, index_map,
                                    pipeline_mode=pl.Buffered(1))
            return pl.BlockSpec(shape, index_map)

        in_specs = [
            pl.BlockSpec((tm, C), lambda i, h: (i, 0)),                 # x tile
            spec((C, th), lambda i, h: (0, h), resident=(n_h == 1)),    # w_fc
            spec((1, th), lambda i, h: (0, h), resident=(n_h == 1)),    # b_fc
            spec((th, C), lambda i, h: (h, 0), resident=(n_h == 1)),    # w_proj
            spec((1, C), lambda i, h: (0, 0), resident=True),           # b_proj
        ]
        return pl.pallas_call(
            kernel,
            out_shape=jax.ShapeDtypeStruct((m_pad, C), out_dtype),
            grid_spec=pltpu.PrefetchScalarGridSpec(
                num_scalar_prefetch=0,
                grid=grid,
                in_specs=in_specs,
                out_specs=pl.BlockSpec((tm, C), lambda i, h: (i, 0)),
                scratch_shapes=[pltpu.VMEM((tm, C), jnp.float32)],
            ),
            compiler_params=pltpu.CompilerParams(
                dimension_semantics=("parallel", "arbitrary"),
                vmem_limit_bytes=vmem_limit,
            ),
        )(x2, w_fc_c, b_fc_c, w_proj_c, b_proj_c)

    try:
        out2 = make_call(True)
    except Exception:
        # Buffered(1) not supported by this JAX build: default double-buffering.
        out2 = make_call(False)

    return out2[:M].reshape(B, T, C)


# ---------------- pure-JAX reference (for verification) ----------------------
def mlp_ref(x, w_fc, b_fc, w_proj, b_proj):
    fc = x @ w_fc + b_fc
    g = 0.5 * fc * (1.0 + jnp.tanh(_GELU_C * (fc + 0.044715 * fc ** 3)))
    return g @ w_proj + b_proj


if __name__ == "__main__":
    # GPTConfig: n_embd=32 -> hidden 4*n_embd=128; B=2, T=8
    B, T, C = 2, 8, 32
    H = 4 * C

    key = jax.random.PRNGKey(0)
    k = jax.random.split(key, 5)

    x = jax.random.normal(k[0], (B, T, C), dtype=jnp.float32)
    w_fc = (0.02 * jax.random.normal(k[1], (C, H))).astype(jnp.float32)
    b_fc = (0.02 * jax.random.normal(k[2], (H,))).astype(jnp.float32)
    w_proj = (0.02 * jax.random.normal(k[3], (H, C))).astype(jnp.float32)
    b_proj = (0.02 * jax.random.normal(k[4], (C,))).astype(jnp.float32)

    out = mlp_forward(x, w_fc, b_fc, w_proj, b_proj, use_bf16=True)
    out = jax.block_until_ready(out)

    ref = mlp_ref(x, w_fc, b_fc, w_proj, b_proj)
    assert out.shape == (B, T, C)
    assert jnp.allclose(out, ref, rtol=2e-2, atol=1e-2), "mismatch vs reference"

    print("KERNEL_OK")
</pallas_src>

<mosaic_0001>
module attributes {stable_mosaic.version = 11 : i64} {
  func.func @mlp_kernel(%arg0: i32, %arg1: i32, %arg2: memref<16x32xf32, #tpu.memory_space<vmem>>, %arg3: memref<32x128xbf16, #tpu.memory_space<vmem>>, %arg4: memref<1x128xf32, #tpu.memory_space<vmem>>, %arg5: memref<128x32xbf16, #tpu.memory_space<vmem>>, %arg6: memref<1x32xf32, #tpu.memory_space<vmem>>, %arg7: memref<16x32xf32, #tpu.memory_space<vmem>>, %arg8: memref<16x32xf32, #tpu.memory_space<vmem>>) attributes {dimension_semantics = [#tpu.dimension_semantics<parallel>, #tpu.dimension_semantics<arbitrary>], iteration_bounds = array<i64: 1, 1>, scalar_prefetch = 0 : i64, scratch_operands = 1 : i64, tpu.core_type = #tpu.core_type<tc>, window_params = [{transform_indices = @transform_0, window_bounds = array<i64: 16, 32>}, {pipeline_mode = #tpu.pipeline_mode<synchronous>, transform_indices = @transform_1, window_bounds = array<i64: 32, 128>}, {pipeline_mode = #tpu.pipeline_mode<synchronous>, transform_indices = @transform_2, window_bounds = array<i64: 1, 128>}, {pipeline_mode = #tpu.pipeline_mode<synchronous>, transform_indices = @transform_3, window_bounds = array<i64: 128, 32>}, {pipeline_mode = #tpu.pipeline_mode<synchronous>, transform_indices = @transform_4, window_bounds = array<i64: 1, 32>}, {transform_indices = @transform_5, window_bounds = array<i64: 16, 32>}]} {
    %c0_i32 = arith.constant 0 : i32
    %0 = arith.cmpi eq, %arg1, %c0_i32 : i32
    %1 = arith.extui %0 : i1 to i32
    %c0_i32_0 = arith.constant 0 : i32
    %2 = arith.cmpi ne, %1, %c0_i32_0 : i32
    scf.if %2 {
      %cst_19 = arith.constant 0.000000e+00 : f32
      %32 = vector.broadcast %cst_19 : f32 to vector<16x32xf32>
      %c0_20 = arith.constant 0 : index
      %c0_21 = arith.constant 0 : index
      %33 = vector.load %arg8[%c0_20, %c0_21] : memref<16x32xf32, #tpu.memory_space<vmem>>, vector<16x32xf32>
      tpu.vector_store %arg8[%c0_20, %c0_21], %32 {strides = array<i32>} : memref<16x32xf32, #tpu.memory_space<vmem>>, vector<16x32xf32>,
    } else {
    }
    %c0 = arith.constant 0 : index
    %c0_1 = arith.constant 0 : index
    %3 = vector.load %arg2[%c0, %c0_1] : memref<16x32xf32, #tpu.memory_space<vmem>>, vector<16x32xf32>
    %4 = arith.truncf %3 : vector<16x32xf32> to vector<16x32xbf16>
    %c0_2 = arith.constant 0 : index
    %c0_3 = arith.constant 0 : index
    %5 = vector.load %arg3[%c0_2, %c0_3] : memref<32x128xbf16, #tpu.memory_space<vmem>>, vector<32x128xbf16>
    %cst = arith.constant dense<0.000000e+00> : vector<16x128xf32>
    %6 = tpu.matmul %4, %5, %cst {dimension_numbers = #tpu.dot_dimension_numbers<[1], [0], [0], [1], [0, 0, 1, 1], [], []>} : vector<16x32xbf16>, vector<32x128xbf16>, vector<16x128xf32> -> vector<16x128xf32>
    %c0_4 = arith.constant 0 : index
    %c0_5 = arith.constant 0 : index
    %7 = vector.load %arg4[%c0_4, %c0_5] : memref<1x128xf32, #tpu.memory_space<vmem>>, vector<1x128xf32>
    %8 = vector.broadcast %7 : vector<1x128xf32> to vector<16x128xf32>
    %9 = arith.addf %6, %8 : vector<16x128xf32>
    %cst_6 = arith.constant 5.000000e-01 : f32
    %10 = vector.broadcast %cst_6 : f32 to vector<16x128xf32>
    %11 = arith.mulf %10, %9 : vector<16x128xf32>
    %cst_7 = arith.constant 4.471500e-02 : f32
    %12 = vector.broadcast %cst_7 : f32 to vector<16x128xf32>
    %13 = arith.mulf %12, %9 : vector<16x128xf32>
    %14 = arith.mulf %13, %9 : vector<16x128xf32>
    %15 = arith.mulf %14, %9 : vector<16x128xf32>
    %16 = arith.addf %9, %15 : vector<16x128xf32>
    %cst_8 = arith.constant 0.797884583 : f32
    %17 = vector.broadcast %cst_8 : f32 to vector<16x128xf32>
    %18 = arith.mulf %17, %16 : vector<16x128xf32>
    %19 = math.tanh %18 : vector<16x128xf32>
    %cst_9 = arith.constant 1.000000e+00 : f32
    %20 = vector.broadcast %cst_9 : f32 to vector<16x128xf32>
    %21 = arith.addf %20, %19 : vector<16x128xf32>
    %22 = arith.mulf %11, %21 : vector<16x128xf32>
    %c0_10 = arith.constant 0 : index
    %c0_11 = arith.constant 0 : index
    %23 = vector.load %arg8[%c0_10, %c0_11] : memref<16x32xf32, #tpu.memory_space<vmem>>, vector<16x32xf32>
    %24 = arith.truncf %22 : vector<16x128xf32> to vector<16x128xbf16>
    %c0_12 = arith.constant 0 : index
    %c0_13 = arith.constant 0 : index
    %25 = vector.load %arg5[%c0_12, %c0_13] : memref<128x32xbf16, #tpu.memory_space<vmem>>, vector<128x32xbf16>
    %cst_14 = arith.constant dense<0.000000e+00> : vector<16x32xf32>
    %26 = tpu.matmul %24, %25, %cst_14 {dimension_numbers = #tpu.dot_dimension_numbers<[1], [0], [0], [1], [0, 0, 1, 1], [], []>} : vector<16x128xbf16>, vector<128x32xbf16>, vector<16x32xf32> -> vector<16x32xf32>
    %27 = arith.addf %23, %26 : vector<16x32xf32>
    %c0_15 = arith.constant 0 : index
    %c0_16 = arith.constant 0 : index
    %28 = vector.load %arg8[%c0_15, %c0_16] : memref<16x32xf32, #tpu.memory_space<vmem>>, vector<16x32xf32>
    tpu.vector_store %arg8[%c0_15, %c0_16], %27 {strides = array<i32>} : memref<16x32xf32, #tpu.memory_space<vmem>>, vector<16x32xf32>,
    %c0_i32_17 = arith.constant 0 : i32
    %29 = arith.cmpi eq, %arg1, %c0_i32_17 : i32
    %30 = arith.extui %29 : i1 to i32
    %c0_i32_18 = arith.constant 0 : i32
    %31 = arith.cmpi ne, %30, %c0_i32_18 : i32
    scf.if %31 {
      %c0_19 = arith.constant 0 : index
      %c0_20 = arith.constant 0 : index
      %32 = vector.load %arg8[%c0_19, %c0_20] : memref<16x32xf32, #tpu.memory_space<vmem>>, vector<16x32xf32>
      %c0_21 = arith.constant 0 : index
      %c0_22 = arith.constant 0 : index
      %33 = vector.load %arg6[%c0_21, %c0_22] : memref<1x32xf32, #tpu.memory_space<vmem>>, vector<1x32xf32>
      %34 = vector.broadcast %33 : vector<1x32xf32> to vector<16x32xf32>
      %35 = arith.addf %32, %34 : vector<16x32xf32>
      %c0_23 = arith.constant 0 : index
      %c0_24 = arith.constant 0 : index
      %36 = vector.load %arg7[%c0_23, %c0_24] : memref<16x32xf32, #tpu.memory_space<vmem>>, vector<16x32xf32>
      tpu.vector_store %arg7[%c0_23, %c0_24], %35 {strides = array<i32>} : memref<16x32xf32, #tpu.memory_space<vmem>>, vector<16x32xf32>,
    } else {
    }
    return
  }
  func.func @transform_0(%arg0: i32, %arg1: i32) -> (i32, i32) {
    %c0_i32 = arith.constant 0 : i32
    %c0_i32_0 = arith.constant 0 : i32
    return %arg0, %c0_i32 : i32, i32
  }
  func.func @transform_1(%arg0: i32, %arg1: i32) -> (i32, i32) {
    %c0_i32 = arith.constant 0 : i32
    %c0_i32_0 = arith.constant 0 : i32
    return %c0_i32, %arg1 : i32, i32
  }
  func.func @transform_2(%arg0: i32, %arg1: i32) -> (i32, i32) {
    %c0_i32 = arith.constant 0 : i32
    %c0_i32_0 = arith.constant 0 : i32
    return %c0_i32, %arg1 : i32, i32
  }
  func.func @transform_3(%arg0: i32, %arg1: i32) -> (i32, i32) {
    %c0_i32 = arith.constant 0 : i32
    %c0_i32_0 = arith.constant 0 : i32
    return %arg1, %c0_i32 : i32, i32
  }
  func.func @transform_4(%arg0: i32, %arg1: i32) -> (i32, i32) {
    %c0_i32 = arith.constant 0 : i32
    %c0_i32_0 = arith.constant 0 : i32
    %c0_i32_1 = arith.constant 0 : i32
    return %c0_i32, %c0_i32_0 : i32, i32
  }
  func.func @transform_5(%arg0: i32, %arg1: i32) -> (i32, i32) {
    %c0_i32 = arith.constant 0 : i32
    %c0_i32_0 = arith.constant 0 : i32
    return %arg0, %c0_i32 : i32, i32
  }
}

module attributes {stable_mosaic.version = 11 : i64} {
  func.func @mlp_kernel(%arg0: i32, %arg1: i32, %arg2: memref<16x32xf32, #tpu.memory_space<vmem>>, %arg3: memref<32x128xbf16, #tpu.memory_space<vmem>>, %arg4: memref<1x128xf32, #tpu.memory_space<vmem>>, %arg5: memref<128x32xbf16, #tpu.memory_space<vmem>>, %arg6: memref<1x32xf32, #tpu.memory_space<vmem>>, %arg7: memref<16x32xf32, #tpu.memory_space<vmem>>, %arg8: memref<16x32xf32, #tpu.memory_space<vmem>>) attributes {dimension_semantics = [#tpu.dimension_semantics<parallel>, #tpu.dimension_semantics<arbitrary>], iteration_bounds = array<i64: 1, 1>, scalar_prefetch = 0 : i64, scratch_operands = 1 : i64, tpu.core_type = #tpu.core_type<tc>, window_params = [{transform_indices = @transform_0, window_bounds = array<i64: 16, 32>}, {transform_indices = @transform_1, window_bounds = array<i64: 32, 128>}, {transform_indices = @transform_2, window_bounds = array<i64: 1, 128>}, {transform_indices = @transform_3, window_bounds = array<i64: 128, 32>}, {pipeline_mode = #tpu.pipeline_mode<synchronous>, transform_indices = @transform_4, window_bounds = array<i64: 1, 32>}, {transform_indices = @transform_5, window_bounds = array<i64: 16, 32>}]} {
    %c0_i32 = arith.constant 0 : i32
    %0 = arith.cmpi eq, %arg1, %c0_i32 : i32
    %1 = arith.extui %0 : i1 to i32
    %c0_i32_0 = arith.constant 0 : i32
    %2 = arith.cmpi ne, %1, %c0_i32_0 : i32
    scf.if %2 {
      %cst_19 = arith.constant 0.000000e+00 : f32
      %32 = vector.broadcast %cst_19 : f32 to vector<16x32xf32>
      %c0_20 = arith.constant 0 : index
      %c0_21 = arith.constant 0 : index
      %33 = vector.load %arg8[%c0_20, %c0_21] : memref<16x32xf32, #tpu.memory_space<vmem>>, vector<16x32xf32>
      tpu.vector_store %arg8[%c0_20, %c0_21], %32 {strides = array<i32>} : memref<16x32xf32, #tpu.memory_space<vmem>>, vector<16x32xf32>,
    } else {
    }
    %c0 = arith.constant 0 : index
    %c0_1 = arith.constant 0 : index
    %3 = vector.load %arg2[%c0, %c0_1] : memref<16x32xf32, #tpu.memory_space<vmem>>, vector<16x32xf32>
    %4 = arith.truncf %3 : vector<16x32xf32> to vector<16x32xbf16>
    %c0_2 = arith.constant 0 : index
    %c0_3 = arith.constant 0 : index
    %5 = vector.load %arg3[%c0_2, %c0_3] : memref<32x128xbf16, #tpu.memory_space<vmem>>, vector<32x128xbf16>
    %cst = arith.constant dense<0.000000e+00> : vector<16x128xf32>
    %6 = tpu.matmul %4, %5, %cst {dimension_numbers = #tpu.dot_dimension_numbers<[1], [0], [0], [1], [0, 0, 1, 1], [], []>} : vector<16x32xbf16>, vector<32x128xbf16>, vector<16x128xf32> -> vector<16x128xf32>
    %c0_4 = arith.constant 0 : index
    %c0_5 = arith.constant 0 : index
    %7 = vector.load %arg4[%c0_4, %c0_5] : memref<1x128xf32, #tpu.memory_space<vmem>>, vector<1x128xf32>
    %8 = vector.broadcast %7 : vector<1x128xf32> to vector<16x128xf32>
    %9 = arith.addf %6, %8 : vector<16x128xf32>
    %cst_6 = arith.constant 5.000000e-01 : f32
    %10 = vector.broadcast %cst_6 : f32 to vector<16x128xf32>
    %11 = arith.mulf %10, %9 : vector<16x128xf32>
    %cst_7 = arith.constant 4.471500e-02 : f32
    %12 = vector.broadcast %cst_7 : f32 to vector<16x128xf32>
    %13 = arith.mulf %12, %9 : vector<16x128xf32>
    %14 = arith.mulf %13, %9 : vector<16x128xf32>
    %15 = arith.mulf %14, %9 : vector<16x128xf32>
    %16 = arith.addf %9, %15 : vector<16x128xf32>
    %cst_8 = arith.constant 0.797884583 : f32
    %17 = vector.broadcast %cst_8 : f32 to vector<16x128xf32>
    %18 = arith.mulf %17, %16 : vector<16x128xf32>
    %19 = math.tanh %18 : vector<16x128xf32>
    %cst_9 = arith.constant 1.000000e+00 : f32
    %20 = vector.broadcast %cst_9 : f32 to vector<16x128xf32>
    %21 = arith.addf %20, %19 : vector<16x128xf32>
    %22 = arith.mulf %11, %21 : vector<16x128xf32>
    %c0_10 = arith.constant 0 : index
    %c0_11 = arith.constant 0 : index
    %23 = vector.load %arg8[%c0_10, %c0_11] : memref<16x32xf32, #tpu.memory_space<vmem>>, vector<16x32xf32>
    %24 = arith.truncf %22 : vector<16x128xf32> to vector<16x128xbf16>
    %c0_12 = arith.constant 0 : index
    %c0_13 = arith.constant 0 : index
    %25 = vector.load %arg5[%c0_12, %c0_13] : memref<128x32xbf16, #tpu.memory_space<vmem>>, vector<128x32xbf16>
    %cst_14 = arith.constant dense<0.000000e+00> : vector<16x32xf32>
    %26 = tpu.matmul %24, %25, %cst_14 {dimension_numbers = #tpu.dot_dimension_numbers<[1], [0], [0], [1], [0, 0, 1, 1], [], []>} : vector<16x128xbf16>, vector<128x32xbf16>, vector<16x32xf32> -> vector<16x32xf32>
    %27 = arith.addf %23, %26 : vector<16x32xf32>
    %c0_15 = arith.constant 0 : index
    %c0_16 = arith.constant 0 : index
    %28 = vector.load %arg8[%c0_15, %c0_16] : memref<16x32xf32, #tpu.memory_space<vmem>>, vector<16x32xf32>
    tpu.vector_store %arg8[%c0_15, %c0_16], %27 {strides = array<i32>} : memref<16x32xf32, #tpu.memory_space<vmem>>, vector<16x32xf32>,
    %c0_i32_17 = arith.constant 0 : i32
    %29 = arith.cmpi eq, %arg1, %c0_i32_17 : i32
    %30 = arith.extui %29 : i1 to i32
    %c0_i32_18 = arith.constant 0 : i32
    %31 = arith.cmpi ne, %30, %c0_i32_18 : i32
    scf.if %31 {
      %c0_19 = arith.constant 0 : index
      %c0_20 = arith.constant 0 : index
      %32 = vector.load %arg8[%c0_19, %c0_20] : memref<16x32xf32, #tpu.memory_space<vmem>>, vector<16x32xf32>
      %c0_21 = arith.constant 0 : index
      %c0_22 = arith.constant 0 : index
      %33 = vector.load %arg6[%c0_21, %c0_22] : memref<1x32xf32, #tpu.memory_space<vmem>>, vector<1x32xf32>
      %34 = vector.broadcast %33 : vector<1x32xf32> to vector<16x32xf32>
      %35 = arith.addf %32, %34 : vector<16x32xf32>
      %c0_23 = arith.constant 0 : index
      %c0_24 = arith.constant 0 : index
      %36 = vector.load %arg7[%c0_23, %c0_24] : memref<16x32xf32, #tpu.memory_space<vmem>>, vector<16x32xf32>
      tpu.vector_store %arg7[%c0_23, %c0_24], %35 {strides = array<i32>} : memref<16x32xf32, #tpu.memory_space<vmem>>, vector<16x32xf32>,
    } else {
    }
    return
  }
  func.func @transform_0(%arg0: i32, %arg1: i32) -> (i32, i32) {
    %c0_i32 = arith.constant 0 : i32
    %c0_i32_0 = arith.constant 0 : i32
    return %arg0, %c0_i32 : i32, i32
  }
  func.func @transform_1(%arg0: i32, %arg1: i32) -> (i32, i32) {
    %c0_i32 = arith.constant 0 : i32
    %c0_i32_0 = arith.constant 0 : i32
    return %c0_i32, %arg1 : i32, i32
  }
  func.func @transform_2(%arg0: i32, %arg1: i32) -> (i32, i32) {
    %c0_i32 = arith.constant 0 : i32
    %c0_i32_0 = arith.constant 0 : i32
    return %c0_i32, %arg1 : i32, i32
  }
  func.func @transform_3(%arg0: i32, %arg1: i32) -> (i32, i32) {
    %c0_i32 = arith.constant 0 : i32
    %c0_i32_0 = arith.constant 0 : i32
    return %arg1, %c0_i32 : i32, i32
  }
  func.func @transform_4(%arg0: i32, %arg1: i32) -> (i32, i32) {
    %c0_i32 = arith.constant 0 : i32
    %c0_i32_0 = arith.constant 0 : i32
    %c0_i32_1 = arith.constant 0 : i32
    return %c0_i32, %c0_i32_0 : i32, i32
  }
  func.func @transform_5(%arg0: i32, %arg1: i32) -> (i32, i32) {
    %c0_i32 = arith.constant 0 : i32
    %c0_i32_0 = arith.constant 0 : i32
    return %arg0, %c0_i32 : i32, i32
  }
}

</mosaic_0001>

<bundles_post_ra>
// kernel: tpu_custom_call.1
= control target key start
LH: loop header
LB: loop body
LE: loop exit
PB: predicated region body
PF: predicated region fallthrough
CT: control target
= control target key end

     0   :  { %v356_v1 = vmov 0.0   ;;  %vm357_vm0 = vmmov 0   ;;  %vm26_vm1 = vcmask 261120   ;;  %s443_s0 = inlined_call_operand.vmem [shape: f32[16,32], index: 0, kind: input, shape index: {}]   ;;  %s444_s1 = inlined_call_operand.vmem [shape: bf16[32,128], index: 1, kind: input, shape index: {}]   ;;  %s445_s2 = inlined_call_operand.vmem [shape: f32[1,128], index: 2, kind: input, shape index: {}]   ;;  %s446_s3 = inlined_call_operand.vmem [shape: bf16[128,32], index: 3, kind: input, shape index: {}]   ;;  %s447_s4 = inlined_call_operand.vmem [shape: f32[1,32], index: 4, kind: input, shape index: {}]   ;;  %s448_s5 = inlined_call_operand.hbm [shape: f32[16,32], index: 5, kind: output, shape index: {}]  }
   0x1   :  { %v320_v0 = vld [vmem:[%s444_s1 + $0x8] sm:$0xff]   ;;  %287 = vmatprep.subr.bf16.mxu0 %v356_v1  ;;  %295 = vmatprep.subr.bf16.mxu1 %v356_v1  ;;  %v321_v2 = vld [vmem:[%s444_s1] sm:$0xff]   ;;  %27 = vst.msk [vmem:[#allocation2] sm:$0xff] %vm26_vm1, %v356_v1  ;;  %28 = vst.msk [vmem:[#allocation2 + $0x8] sm:$0xff] %vm26_vm1, %v356_v1 }
   0x2   :  { %288 = vmatpush3.bf16.msra.mxu0 %v320_v0  ;;  %291 = vmatprep.mubr.msk.bf16.mxu0 %vm357_vm0, %v356_v1  ;;  %v29_v3 = vld [vmem:[%s443_s0] sm:$0xff]  ;;  %v30_v4 = vld [vmem:[%s443_s0 + $0x8] sm:$0xff] }
   0x3   :  { %289 = vmatprep.subr.bf16.mxu0 %v356_v1  ;;  %311 = vmatprep.mubr.msk.bf16.mxu1 %vm357_vm0, %v356_v1  ;;  %v31_v5 = vpack.c.bf16 %v30_v4, %v29_v3 }
   0x6   :  { %290 = vmatpush3.bf16.msra.mxu0 %v321_v2 }
   0x7   :  { %10 = vsyncpa [#allocation4], 0  ;;  %v322_v6 = vld [vmem:[%s446_s3 + $0x38] sm:$0xff]   ;;  %v323_v7 = vld [vmem:[%s446_s3 + $0x30] sm:$0xff]   ;;  %s358_s17 = smov [#allocation3]  }
   0x8   :  { %296 = vmatpush3.bf16.msra.mxu1 %v322_v6  ;;  %v324_v8 = vld [vmem:[%s446_s3 + $0x28] sm:$0xff]   ;;  %v325_v9 = vld [vmem:[%s446_s3 + $0x20] sm:$0xff]   ;;  %v326_v10 = vld [vmem:[%s446_s3 + $0x18] sm:$0xff]   ;;  %s251_s18 = sshll.u32 %s358_s17, 4  ;;  %s252_s18 = int_to_ptr.vmem [resolvable:$true] %s251_s18 }
   0x9   :  { %292 = vmatmul.mubr.msk.bf16.vlgmr.msra.gmra.mxu0 %vm26_vm1, %v31_v5  ;;  %297 = vmatprep.subr.bf16.mxu1 %v356_v1  ;;  %v327_v11 = vld [vmem:[%s446_s3 + $0x10] sm:$0xff]   ;;  %v328_v12 = vld [vmem:[%s446_s3 + $0x8] sm:$0xff]   ;;  %v329_v13 = vld [vmem:[%s446_s3] sm:$0xff]   ;;  %s334_s19 = scalar_lea.vmem %s252_s18, 256  ;;  %p339_p1 = scmp.lt.s32.totalorder %s252_s18, %s252_s18 }
   0xa   :  { %v262_v14 = vld [vmem:[%s445_s2] ss:$0 sm:$0xff]  ;;  %v119_v44 = vld [vmem:[#allocation2 + $0x8] sm:$0xff]  ;;  %p335_p0 = scmp.ne.s32.totalorder %s252_s18, %s334_s19  ;;  %p340_p2 = scmp.lt.s32.totalorder %s334_s19, %s334_s19 }
   0xb   :  { %v118_v40 = vld [vmem:[#allocation2] sm:$0xff] }
   0xc   :  { %298 = vmatpush3.bf16.msra.mxu1 %v323_v7  ;;  %v274_v48 = vld [vmem:[%s447_s4] ss:$0 sm:$0xff]  ;;  %p341_p3 = por %p340_p2, %p339_p1 }
   0xd   :  { %299 = vmatprep.subr.bf16.mxu1 %v356_v1 }
   0xe   :  { %p342_p4 = pnand %p341_p3, %p335_p0 }
  0x10   :  { %300 = vmatpush3.bf16.msra.mxu1 %v324_v8 }
  0x11   :  { %301 = vmatprep.subr.bf16.mxu1 %v356_v1 }
  0x14   :  { %302 = vmatpush3.bf16.msra.mxu1 %v325_v9 }
  0x15   :  { %303 = vmatprep.subr.bf16.mxu1 %v356_v1 }
  0x18   :  { %304 = vmatpush3.bf16.msra.mxu1 %v326_v10 }
  0x19   :  { %305 = vmatprep.subr.bf16.mxu1 %v356_v1 }
  0x1c   :  { %306 = vmatpush3.bf16.msra.mxu1 %v327_v11 }
  0x1d   :  { %307 = vmatprep.subr.bf16.mxu1 %v356_v1 }
  0x20   :  { %308 = vmatpush3.bf16.msra.mxu1 %v328_v12 }
  0x21   :  { %309 = vmatprep.subr.bf16.mxu1 %v356_v1 }
  0x24   :  { %310 = vmatpush3.bf16.msra.mxu1 %v329_v13 }
  0xc9   :  { %v93_v15 = vpop.f32.mrf.mxu0 }
  0xca   :  { %v94_v16 = vadd.f32 %v262_v14, %v93_v15 }
  0xcb   :  { %v293_v17 = vpop.f32.mrf.mxu0 }
  0xcc   :  { %v102_v18 = vmul.f32 0.044715, %v94_v16  ;;  %v100_v34 = vmul.f32 0.5, %v94_v16 }
  0xcd   :  { %v96_v19 = vpop.f32.mrf.mxu0 }
  0xce   :  { %v104_v20 = vmul.f32 %v102_v18, %v94_v16  ;;  %v97_v21 = vadd.f32 %v262_v14, %v96_v19 }
  0xcf   :  { %v294_v22 = vpop.f32.mrf.mxu0 }
  0xd0   :  { %v106_v23 = vmul.f32 %v104_v20, %v94_v16  ;;  %v103_v24 = vmul.f32 0.044715, %v97_v21  ;;  %v101_v35 = vmul.f32 0.5, %v97_v21 }
  0xd2   :  { %v105_v25 = vmul.f32 %v103_v24, %v97_v21  ;;  %v108_v26 = vadd.f32 %v106_v23, %v94_v16 }
  0xd4   :  { %v107_v27 = vmul.f32 %v105_v25, %v97_v21  ;;  %v110_v28 = vmul.f32 0.7978846, %v108_v26 }
  0xd6   :  { %v109_v29 = vadd.f32 %v107_v27, %v97_v21  ;;  %330 = vtanh.f32 %v110_v28 }
  0xd8   :  { %v111_v30 = vmul.f32 0.7978846, %v109_v29 }
  0xda   :  { %332 = vtanh.f32 %v111_v30 }
  0xe3   :  { %v331_v31 = vpop.eup %330 }
  0xe4   :  { %v114_v32 = vadd.f32 1.0, %v331_v31 }
  0xe6   :  { %v116_v37 = vmul.f32 %v114_v32, %v100_v34 }
  0xe7   :  { %v333_v33 = vpop.eup %332 }
  0xe8   :  { %v115_v36 = vadd.f32 1.0, %v333_v33 }
  0xea   :  { %v117_v38 = vmul.f32 %v115_v36, %v101_v35 }
  0xec   :  { %v120_v39 = vpack.c.bf16 %v117_v38, %v116_v37 }
  0xee   :  { %312 = vmatmul.mubr.bf16.vlgmr.msra.gmra.mxu1 %v120_v39 }
 0x1ae   :  { %v219_v41 = vpop.f32.mrf.mxu1 }
 0x1af   :  { %v226_v42 = vadd.f32 %v219_v41, %v118_v40 }
 0x1b0   :  { %v313_v43 = vpop.f32.mrf.mxu1 }
 0x1b1   :  { %228 = vst.msk [vmem:[#allocation2] sm:$0xff] %vm26_vm1, %v226_v42 }
 0x1b2   :  { %v222_v45 = vpop.f32.mrf.mxu1 }
 0x1b3   :  { %v227_v46 = vadd.f32 %v222_v45, %v119_v44 }
 0x1b4   :  { %v314_v47 = vpop.f32.mrf.mxu1 }
 0x1b5   :  { %229 = vst.msk [vmem:[#allocation2 + $0x8] sm:$0xff] %vm26_vm1, %v227_v46 }
 0x1b8   :  { %v233_v49 = vld [vmem:[#allocation2] sm:$0xff] }
 0x1b9   :  { %v242_v50 = vadd.f32 %v274_v48, %v233_v49 }
 0x1bb   :  { %244 = vst.msk [vmem:[#allocation3] sm:$0xff] %vm26_vm1, %v242_v50 }
 0x1bc   :  { %v234_v51 = vld [vmem:[#allocation2 + $0x8] sm:$0xff] }
 0x1bd   :  { %v243_v52 = vadd.f32 %v274_v48, %v234_v51 }
 0x1bf   :  { %245 = vst.msk [vmem:[#allocation3 + $0x8] sm:$0xff] %vm26_vm1, %v243_v52 }
 0x1c0   :  { %345 = shalt.err (!%p342_p4)
}
 0x1c1   :  { %s359_s20 = smov 128   ;;  %s360_s4 = smov 8  }
 0x1c2   :  { %257 = dma.vmem_to_hbm [thread:$0]  %s252_s18, 256, %s448_s5, [#allocation4], %s359_s20, %s359_s20, %s360_s4  }
 0x1c3   :  { %354 = dma.done.wait [#allocation4], 256  }
 0x1c4   :  { %355 = vsyncadd [#allocation4], 4294967040 }
 0x1c5   :  { %261 = vsyncpa [#allocation4], 1 }

// kernel: tpu_custom_call.1
= control target key start
LH: loop header
LB: loop body
LE: loop exit
PB: predicated region body
PF: predicated region fallthrough
CT: control target
= control target key end

     0   :  { %v356_v1 = vmov 0.0   ;;  %vm357_vm0 = vmmov 0   ;;  %vm26_vm1 = vcmask 261120   ;;  %s443_s0 = inlined_call_operand.vmem [shape: f32[16,32], index: 0, kind: input, shape index: {}]   ;;  %s444_s1 = inlined_call_operand.vmem [shape: bf16[32,128], index: 1, kind: input, shape index: {}]   ;;  %s445_s2 = inlined_call_operand.vmem [shape: f32[1,128], index: 2, kind: input, shape index: {}]   ;;  %s446_s3 = inlined_call_operand.vmem [shape: bf16[128,32], index: 3, kind: input, shape index: {}]   ;;  %s447_s4 = inlined_call_operand.vmem [shape: f32[1,32], index: 4, kind: input, shape index: {}]   ;;  %s448_s5 = inlined_call_operand.hbm [shape: f32[16,32], index: 5, kind: output, shape index: {}]  }
   0x1   :  { %v320_v0 = vld [vmem:[%s444_s1 + $0x8] sm:$0xff]   ;;  %287 = vmatprep.subr.bf16.mxu0 %v356_v1  ;;  %295 = vmatprep.subr.bf16.mxu1 %v356_v1  ;;  %v321_v2 = vld [vmem:[%s444_s1] sm:$0xff]   ;;  %27 = vst.msk [vmem:[#allocation2] sm:$0xff] %vm26_vm1, %v356_v1  ;;  %28 = vst.msk [vmem:[#allocation2 + $0x8] sm:$0xff] %vm26_vm1, %v356_v1 }
   0x2   :  { %288 = vmatpush3.bf16.msra.mxu0 %v320_v0  ;;  %291 = vmatprep.mubr.msk.bf16.mxu0 %vm357_vm0, %v356_v1  ;;  %v29_v3 = vld [vmem:[%s443_s0] sm:$0xff]  ;;  %v30_v4 = vld [vmem:[%s443_s0 + $0x8] sm:$0xff] }
   0x3   :  { %289 = vmatprep.subr.bf16.mxu0 %v356_v1  ;;  %311 = vmatprep.mubr.msk.bf16.mxu1 %vm357_vm0, %v356_v1  ;;  %v31_v5 = vpack.c.bf16 %v30_v4, %v29_v3 }
   0x6   :  { %290 = vmatpush3.bf16.msra.mxu0 %v321_v2 }
   0x7   :  { %10 = vsyncpa [#allocation4], 0  ;;  %v322_v6 = vld [vmem:[%s446_s3 + $0x38] sm:$0xff]   ;;  %v323_v7 = vld [vmem:[%s446_s3 + $0x30] sm:$0xff]   ;;  %s358_s17 = smov [#allocation3]  }
   0x8   :  { %296 = vmatpush3.bf16.msra.mxu1 %v322_v6  ;;  %v324_v8 = vld [vmem:[%s446_s3 + $0x28] sm:$0xff]   ;;  %v325_v9 = vld [vmem:[%s446_s3 + $0x20] sm:$0xff]   ;;  %v326_v10 = vld [vmem:[%s446_s3 + $0x18] sm:$0xff]   ;;  %s251_s18 = sshll.u32 %s358_s17, 4  ;;  %s252_s18 = int_to_ptr.vmem [resolvable:$true] %s251_s18 }
   0x9   :  { %292 = vmatmul.mubr.msk.bf16.vlgmr.msra.gmra.mxu0 %vm26_vm1, %v31_v5  ;;  %297 = vmatprep.subr.bf16.mxu1 %v356_v1  ;;  %v327_v11 = vld [vmem:[%s446_s3 + $0x10] sm:$0xff]   ;;  %v328_v12 = vld [vmem:[%s446_s3 + $0x8] sm:$0xff]   ;;  %v329_v13 = vld [vmem:[%s446_s3] sm:$0xff]   ;;  %s334_s19 = scalar_lea.vmem %s252_s18, 256  ;;  %p339_p1 = scmp.lt.s32.totalorder %s252_s18, %s252_s18 }
   0xa   :  { %v262_v14 = vld [vmem:[%s445_s2] ss:$0 sm:$0xff]  ;;  %v119_v44 = vld [vmem:[#allocation2 + $0x8] sm:$0xff]  ;;  %p335_p0 = scmp.ne.s32.totalorder %s252_s18, %s334_s19  ;;  %p340_p2 = scmp.lt.s32.totalorder %s334_s19, %s334_s19 }
   0xb   :  { %v118_v40 = vld [vmem:[#allocation2] sm:$0xff] }
   0xc   :  { %298 = vmatpush3.bf16.msra.mxu1 %v323_v7  ;;  %v274_v48 = vld [vmem:[%s447_s4] ss:$0 sm:$0xff]  ;;  %p341_p3 = por %p340_p2, %p339_p1 }
   0xd   :  { %299 = vmatprep.subr.bf16.mxu1 %v356_v1 }
   0xe   :  { %p342_p4 = pnand %p341_p3, %p335_p0 }
  0x10   :  { %300 = vmatpush3.bf16.msra.mxu1 %v324_v8 }
  0x11   :  { %301 = vmatprep.subr.bf16.mxu1 %v356_v1 }
  0x14   :  { %302 = vmatpush3.bf16.msra.mxu1 %v325_v9 }
  0x15   :  { %303 = vmatprep.subr.bf16.mxu1 %v356_v1 }
  0x18   :  { %304 = vmatpush3.bf16.msra.mxu1 %v326_v10 }
  0x19   :  { %305 = vmatprep.subr.bf16.mxu1 %v356_v1 }
  0x1c   :  { %306 = vmatpush3.bf16.msra.mxu1 %v327_v11 }
  0x1d   :  { %307 = vmatprep.subr.bf16.mxu1 %v356_v1 }
  0x20   :  { %308 = vmatpush3.bf16.msra.mxu1 %v328_v12 }
  0x21   :  { %309 = vmatprep.subr.bf16.mxu1 %v356_v1 }
  0x24   :  { %310 = vmatpush3.bf16.msra.mxu1 %v329_v13 }
  0xc9   :  { %v93_v15 = vpop.f32.mrf.mxu0 }
  0xca   :  { %v94_v16 = vadd.f32 %v262_v14, %v93_v15 }
  0xcb   :  { %v293_v17 = vpop.f32.mrf.mxu0 }
  0xcc   :  { %v102_v18 = vmul.f32 0.044715, %v94_v16  ;;  %v100_v34 = vmul.f32 0.5, %v94_v16 }
  0xcd   :  { %v96_v19 = vpop.f32.mrf.mxu0 }
  0xce   :  { %v104_v20 = vmul.f32 %v102_v18, %v94_v16  ;;  %v97_v21 = vadd.f32 %v262_v14, %v96_v19 }
  0xcf   :  { %v294_v22 = vpop.f32.mrf.mxu0 }
  0xd0   :  { %v106_v23 = vmul.f32 %v104_v20, %v94_v16  ;;  %v103_v24 = vmul.f32 0.044715, %v97_v21  ;;  %v101_v35 = vmul.f32 0.5, %v97_v21 }
  0xd2   :  { %v105_v25 = vmul.f32 %v103_v24, %v97_v21  ;;  %v108_v26 = vadd.f32 %v106_v23, %v94_v16 }
  0xd4   :  { %v107_v27 = vmul.f32 %v105_v25, %v97_v21  ;;  %v110_v28 = vmul.f32 0.7978846, %v108_v26 }
  0xd6   :  { %v109_v29 = vadd.f32 %v107_v27, %v97_v21  ;;  %330 = vtanh.f32 %v110_v28 }
  0xd8   :  { %v111_v30 = vmul.f32 0.7978846, %v109_v29 }
  0xda   :  { %332 = vtanh.f32 %v111_v30 }
  0xe3   :  { %v331_v31 = vpop.eup %330 }
  0xe4   :  { %v114_v32 = vadd.f32 1.0, %v331_v31 }
  0xe6   :  { %v116_v37 = vmul.f32 %v114_v32, %v100_v34 }
  0xe7   :  { %v333_v33 = vpop.eup %332 }
  0xe8   :  { %v115_v36 = vadd.f32 1.0, %v333_v33 }
  0xea   :  { %v117_v38 = vmul.f32 %v115_v36, %v101_v35 }
  0xec   :  { %v120_v39 = vpack.c.bf16 %v117_v38, %v116_v37 }
  0xee   :  { %312 = vmatmul.mubr.bf16.vlgmr.msra.gmra.mxu1 %v120_v39 }
 0x1ae   :  { %v219_v41 = vpop.f32.mrf.mxu1 }
 0x1af   :  { %v226_v42 = vadd.f32 %v219_v41, %v118_v40 }
 0x1b0   :  { %v313_v43 = vpop.f32.mrf.mxu1 }
 0x1b1   :  { %228 = vst.msk [vmem:[#allocation2] sm:$0xff] %vm26_vm1, %v226_v42 }
 0x1b2   :  { %v222_v45 = vpop.f32.mrf.mxu1 }
 0x1b3   :  { %v227_v46 = vadd.f32 %v222_v45, %v119_v44 }
 0x1b4   :  { %v314_v47 = vpop.f32.mrf.mxu1 }
 0x1b5   :  { %229 = vst.msk [vmem:[#allocation2 + $0x8] sm:$0xff] %vm26_vm1, %v227_v46 }
 0x1b8   :  { %v233_v49 = vld [vmem:[#allocation2] sm:$0xff] }
 0x1b9   :  { %v242_v50 = vadd.f32 %v274_v48, %v233_v49 }
 0x1bb   :  { %244 = vst.msk [vmem:[#allocation3] sm:$0xff] %vm26_vm1, %v242_v50 }
 0x1bc   :  { %v234_v51 = vld [vmem:[#allocation2 + $0x8] sm:$0xff] }
 0x1bd   :  { %v243_v52 = vadd.f32 %v274_v48, %v234_v51 }
 0x1bf   :  { %245 = vst.msk [vmem:[#allocation3 + $0x8] sm:$0xff] %vm26_vm1, %v243_v52 }
 0x1c0   :  { %345 = shalt.err (!%p342_p4)
}
 0x1c1   :  { %s359_s20 = smov 128   ;;  %s360_s4 = smov 8  }
 0x1c2   :  { %257 = dma.vmem_to_hbm [thread:$0]  %s252_s18, 256, %s448_s5, [#allocation4], %s359_s20, %s359_s20, %s360_s4  }
 0x1c3   :  { %354 = dma.done.wait [#allocation4], 256  }
 0x1c4   :  { %355 = vsyncadd [#allocation4], 4294967040 }
 0x1c5   :  { %261 = vsyncpa [#allocation4], 1 }

</bundles_post_ra>
